<compile_context>
chip_gen: v5e
topology: v5e:2x2
jax: 0.10.0
libtpu: 0.0.40
codegen_flags: <defaults>
</compile_context>

<pallas_src>
import jax
import jax.numpy as jnp
from jax.experimental import pallas as pl
from jax.experimental.pallas import tpu as pltpu

# ----- problem sizes (pushing-task dynamics model, training-style batch) -----
STATE_DIM = 4
ACTION_DIM = 4
IN_DIM = STATE_DIM + ACTION_DIM              # 8
HIDDEN = 32
OUT_PAD = 8                                  # STATE_DIM padded to a full sublane group
BATCH = 512                                  # batch of (state, action, target) rows
MSE_SCALE = 1.0 / (BATCH * STATE_DIM)        # true MSE denominator (padding adds zeros)


def _detect_num_cores():
    """2 TensorCores per chip only on v7x; 'parallel' axis is useless elsewhere."""
    try:
        kind = jax.devices()[0].device_kind.lower()
    except Exception:
        return 1
    return 2 if ("v7" in kind or "7x" in kind) else 1


NUM_CORES = _detect_num_cores()
TB = BATCH // NUM_CORES                      # one batch tile per core -> one grid step each

# ----- packed parameter slab: sublane bands, every slice at lane offset 0 -----
SLAB_LANES = 32
R_W1 = 0                      # rows [  0,  32) lanes [0, 8)  : W1^T  (HIDDEN, IN_DIM)
R_W2 = R_W1 + HIDDEN          # rows [ 32,  64) lanes [0,32)  : W2^T  (HIDDEN, HIDDEN)
R_W3 = R_W2 + HIDDEN          # rows [ 64,  72) lanes [0,32)  : W3^T padded (OUT_PAD, HIDDEN)
R_B1 = R_W3 + OUT_PAD         # rows [ 72, 104) lane 0        : b1 column
R_B2 = R_B1 + HIDDEN          # rows [104, 136) lane 0        : b2 column
R_B3 = R_B2 + HIDDEN          # rows [136, 144) lane 0        : b3 column padded
SLAB_ROWS = R_B3 + OUT_PAD    # 144  (multiple of 8)


def single_step_loss_kernel(x_ref, tgt_ref, slab_ref, out_ref):
    """One (IN_DIM, TB) batch tile: MLP forward + scaled sum of squared error."""
    # Tile-aligned static slices of the resident parameter slab (free vreg views).
    w1t = slab_ref[R_W1:R_W1 + HIDDEN, 0:IN_DIM]          # (HIDDEN, IN_DIM)
    w2t = slab_ref[R_W2:R_W2 + HIDDEN, 0:HIDDEN]          # (HIDDEN, HIDDEN)
    w3t = slab_ref[R_W3:R_W3 + OUT_PAD, 0:HIDDEN]         # (OUT_PAD, HIDDEN), rows 4..7 zero
    b1 = slab_ref[R_B1:R_B1 + HIDDEN, 0:1]                # (HIDDEN, 1)
    b2 = slab_ref[R_B2:R_B2 + HIDDEN, 0:1]                # (HIDDEN, 1)
    b3 = slab_ref[R_B3:R_B3 + OUT_PAD, 0:1]               # (OUT_PAD, 1), rows 4..7 zero

    x = x_ref[...]                                         # (IN_DIM, TB), batch on lanes
    h1 = jnp.maximum(
        jnp.dot(w1t, x, preferred_element_type=jnp.float32) + b1, 0.0)
    h2 = jnp.maximum(
        jnp.dot(w2t, h1, preferred_element_type=jnp.float32) + b2, 0.0)
    pred = jnp.dot(w3t, h2, preferred_element_type=jnp.float32) + b3   # (OUT_PAD, TB)

    diff = pred - tgt_ref[...]                             # padded rows are exactly 0
    out_ref[0, 0] = jnp.sum(diff * diff) * MSE_SCALE


def pack_params(params):
    """Pack all weights/biases into one (SLAB_ROWS, SLAB_LANES) f32 slab (sublane bands)."""
    w1, b1, w2, b2, w3, b3 = params

    def band(x, rows):
        x = x.astype(jnp.float32)
        return jnp.pad(x, ((0, rows - x.shape[0]), (0, SLAB_LANES - x.shape[1])))

    return jnp.concatenate(
        [
            band(w1.T, HIDDEN),          # W1^T
            band(w2.T, HIDDEN),          # W2^T
            band(w3.T, OUT_PAD),         # W3^T padded to 8 rows
            band(b1[:, None], HIDDEN),   # b1 column
            band(b2[:, None], HIDDEN),   # b2 column
            band(b3[:, None], OUT_PAD),  # b3 column padded
        ],
        axis=0,
    )


@jax.jit
def single_step_loss(state, action, target_state, params):
    """loss = MSE(model(state, action), target_state), fused in one Pallas call."""
    # Layer-1 fusion + "batch on lanes" layout + output padding, done once in the wrapper
    # (all of it fuses under this jit around the tiny kernel).
    x_t = jnp.concatenate([state, action], axis=-1).T                     # (IN_DIM, BATCH)
    tgt_t = jnp.pad(target_state.T, ((0, OUT_PAD - STATE_DIM), (0, 0)))   # (OUT_PAD, BATCH)
    slab = pack_params(params)                                            # (SLAB_ROWS, SLAB_LANES)

    grid_spec = pltpu.PrefetchScalarGridSpec(
        num_scalar_prefetch=0,
        grid=(NUM_CORES,),
        in_specs=[
            pl.BlockSpec((IN_DIM, TB), lambda p: (0, p)),
            pl.BlockSpec((OUT_PAD, TB), lambda p: (0, p)),
            # Whole parameter slab, constant index map -> DMA'd once, stays resident.
            pl.BlockSpec((SLAB_ROWS, SLAB_LANES), lambda p: (0, 0)),
        ],
        out_specs=pl.BlockSpec((1, 1), lambda p: (p, 0),
                               memory_space=pltpu.MemorySpace.SMEM),
    )

    flops = 2 * BATCH * (IN_DIM * HIDDEN + HIDDEN * HIDDEN + HIDDEN * OUT_PAD)
    bytes_accessed = 4 * (BATCH * IN_DIM + BATCH * OUT_PAD
                          + SLAB_ROWS * SLAB_LANES + NUM_CORES)

    partials = pl.pallas_call(
        single_step_loss_kernel,
        out_shape=jax.ShapeDtypeStruct((NUM_CORES, 1), jnp.float32),
        grid_spec=grid_spec,
        compiler_params=pltpu.CompilerParams(
            dimension_semantics=("parallel",)),
        cost_estimate=pl.CostEstimate(
            flops=flops, transcendentals=0, bytes_accessed=bytes_accessed),
    )(x_t, tgt_t, slab)

    if NUM_CORES == 1:
        return partials[0, 0]          # scale already applied in-kernel; no reduce needed
    return jnp.sum(partials)           # add the two per-core (already scaled) partial MSEs


def reference_single_step_loss(state, action, target_state, params):
    """Pure-JAX reference (matches the PyTorch module semantics with MSELoss)."""
    w1, b1, w2, b2, w3, b3 = params
    x = jnp.concatenate([state, action], axis=-1)
    h1 = jnp.maximum(x @ w1 + b1, 0.0)
    h2 = jnp.maximum(h1 @ w2 + b2, 0.0)
    pred = h2 @ w3 + b3
    return jnp.mean((pred - target_state) ** 2)


def init_params(key):
    """Deterministic synthetic MLP parameters (no checkpoint loading)."""
    k1, k2, k3, k4, k5 = jax.random.split(key, 5)
    s1 = 1.0 / jnp.sqrt(IN_DIM)
    s2 = 1.0 / jnp.sqrt(HIDDEN)
    w1 = jax.random.normal(k1, (IN_DIM, HIDDEN), jnp.float32) * s1
    b1 = jax.random.normal(k2, (HIDDEN,), jnp.float32) * 0.01
    w2 = jax.random.normal(k3, (HIDDEN, HIDDEN), jnp.float32) * s2
    b2 = jnp.zeros((HIDDEN,), jnp.float32)
    w3 = jax.random.normal(k4, (HIDDEN, STATE_DIM), jnp.float32) * s2
    b3 = jax.random.normal(k5, (STATE_DIM,), jnp.float32) * 0.01
    return (w1, b1, w2, b2, w3, b3)


if __name__ == "__main__":
    key = jax.random.PRNGKey(0)
    k_state, k_action, k_target, k_params = jax.random.split(key, 4)

    state = jax.random.normal(k_state, (BATCH, STATE_DIM), jnp.float32)
    action = jax.random.normal(k_action, (BATCH, ACTION_DIM), jnp.float32)
    target_state = jax.random.normal(k_target, (BATCH, STATE_DIM), jnp.float32)
    params = init_params(k_params)

    loss = single_step_loss(state, action, target_state, params)
    loss = jax.block_until_ready(loss)

    ref = reference_single_step_loss(state, action, target_state, params)
    assert jnp.allclose(loss, ref, rtol=1e-4, atol=1e-6), (loss, ref)

    print("KERNEL_OK")
</pallas_src>

<mosaic_0001>
module attributes {stable_mosaic.version = 11 : i64} {
  func.func @single_step_loss_kernel(%arg0: i32, %arg1: memref<8x512xf32, #tpu.memory_space<vmem>>, %arg2: memref<8x512xf32, #tpu.memory_space<vmem>>, %arg3: memref<144x32xf32, #tpu.memory_space<vmem>>, %arg4: memref<1x1xf32, #tpu.memory_space<smem>>) attributes {dimension_semantics = [#tpu.dimension_semantics<parallel>], iteration_bounds = array<i64: 1>, scalar_prefetch = 0 : i64, scratch_operands = 0 : i64, tpu.core_type = #tpu.core_type<tc>, window_params = [{transform_indices = @transform_0, window_bounds = array<i64: 8, 512>}, {transform_indices = @transform_1, window_bounds = array<i64: 8, 512>}, {pipeline_mode = #tpu.pipeline_mode<synchronous>, transform_indices = @transform_2, window_bounds = array<i64: 144, 32>}, {transform_indices = @transform_3, window_bounds = array<i64: 1, 1>}]} {
    %c0 = arith.constant 0 : index
    %c0_0 = arith.constant 0 : index
    %0 = vector.load %arg3[%c0, %c0_0] : memref<144x32xf32, #tpu.memory_space<vmem>>, vector<32x8xf32>
    %c32 = arith.constant 32 : index
    %c0_1 = arith.constant 0 : index
    %1 = vector.load %arg3[%c32, %c0_1] : memref<144x32xf32, #tpu.memory_space<vmem>>, vector<32x32xf32>
    %c64 = arith.constant 64 : index
    %c0_2 = arith.constant 0 : index
    %2 = vector.load %arg3[%c64, %c0_2] : memref<144x32xf32, #tpu.memory_space<vmem>>, vector<8x32xf32>
    %c72 = arith.constant 72 : index
    %c0_3 = arith.constant 0 : index
    %3 = vector.load %arg3[%c72, %c0_3] : memref<144x32xf32, #tpu.memory_space<vmem>>, vector<32x1xf32>
    %c104 = arith.constant 104 : index
    %c0_4 = arith.constant 0 : index
    %4 = vector.load %arg3[%c104, %c0_4] : memref<144x32xf32, #tpu.memory_space<vmem>>, vector<32x1xf32>
    %c136 = arith.constant 136 : index
    %c0_5 = arith.constant 0 : index
    %5 = vector.load %arg3[%c136, %c0_5] : memref<144x32xf32, #tpu.memory_space<vmem>>, vector<8x1xf32>
    %c0_6 = arith.constant 0 : index
    %c0_7 = arith.constant 0 : index
    %6 = vector.load %arg1[%c0_6, %c0_7] : memref<8x512xf32, #tpu.memory_space<vmem>>, vector<8x512xf32>
    %cst = arith.constant dense<0.000000e+00> : vector<32x512xf32>
    %7 = tpu.matmul %0, %6, %cst {dimension_numbers = #tpu.dot_dimension_numbers<[1], [0], [0], [1], [0, 0, 1, 1], [], []>} : vector<32x8xf32>, vector<8x512xf32>, vector<32x512xf32> -> vector<32x512xf32>
    %8 = vector.broadcast %3 : vector<32x1xf32> to vector<32x512xf32>
    %9 = arith.addf %7, %8 : vector<32x512xf32>
    %cst_8 = arith.constant 0.000000e+00 : f32
    %10 = vector.broadcast %cst_8 : f32 to vector<32x512xf32>
    %11 = arith.maximumf %9, %10 : vector<32x512xf32>
    %cst_9 = arith.constant dense<0.000000e+00> : vector<32x512xf32>
    %12 = tpu.matmul %1, %11, %cst_9 {dimension_numbers = #tpu.dot_dimension_numbers<[1], [0], [0], [1], [0, 0, 1, 1], [], []>} : vector<32x32xf32>, vector<32x512xf32>, vector<32x512xf32> -> vector<32x512xf32>
    %13 = vector.broadcast %4 : vector<32x1xf32> to vector<32x512xf32>
    %14 = arith.addf %12, %13 : vector<32x512xf32>
    %cst_10 = arith.constant 0.000000e+00 : f32
    %15 = vector.broadcast %cst_10 : f32 to vector<32x512xf32>
    %16 = arith.maximumf %14, %15 : vector<32x512xf32>
    %cst_11 = arith.constant dense<0.000000e+00> : vector<8x512xf32>
    %17 = tpu.matmul %2, %16, %cst_11 {dimension_numbers = #tpu.dot_dimension_numbers<[1], [0], [0], [1], [0, 0, 1, 1], [], []>} : vector<8x32xf32>, vector<32x512xf32>, vector<8x512xf32> -> vector<8x512xf32>
    %18 = vector.broadcast %5 : vector<8x1xf32> to vector<8x512xf32>
    %19 = arith.addf %17, %18 : vector<8x512xf32>
    %c0_12 = arith.constant 0 : index
    %c0_13 = arith.constant 0 : index
    %20 = vector.load %arg2[%c0_12, %c0_13] : memref<8x512xf32, #tpu.memory_space<vmem>>, vector<8x512xf32>
    %21 = arith.subf %19, %20 : vector<8x512xf32>
    %22 = arith.mulf %21, %21 : vector<8x512xf32>
    %23 = vector.shape_cast %22 : vector<8x512xf32> to vector<1x8x512xf32>
    %cst_14 = arith.constant dense<0.000000e+00> : vector<1xf32>
    %24 = vector.multi_reduction <add>, %23, %cst_14 [1, 2] : vector<1x8x512xf32> to vector<1xf32>
    %25 = vector.shape_cast %24 : vector<1xf32> to vector<1x1x1xf32>
    %26 = vector.extract %25[0, 0, 0] : f32 from vector<1x1x1xf32>
    %cst_15 = arith.constant 4.8828125E-4 : f32
    %27 = arith.mulf %26, %cst_15 : f32
    %c0_16 = arith.constant 0 : index
    %c0_17 = arith.constant 0 : index
    %28 = memref.load %arg4[%c0_16, %c0_17] : memref<1x1xf32, #tpu.memory_space<smem>>
    memref.store %27, %arg4[%c0_16, %c0_17] : memref<1x1xf32, #tpu.memory_space<smem>>
    return
  }
  func.func @transform_0(%arg0: i32) -> (i32, i32) {
    %c0_i32 = arith.constant 0 : i32
    %c0_i32_0 = arith.constant 0 : i32
    return %c0_i32, %arg0 : i32, i32
  }
  func.func @transform_1(%arg0: i32) -> (i32, i32) {
    %c0_i32 = arith.constant 0 : i32
    %c0_i32_0 = arith.constant 0 : i32
    return %c0_i32, %arg0 : i32, i32
  }
  func.func @transform_2(%arg0: i32) -> (i32, i32) {
    %c0_i32 = arith.constant 0 : i32
    %c0_i32_0 = arith.constant 0 : i32
    %c0_i32_1 = arith.constant 0 : i32
    return %c0_i32, %c0_i32_0 : i32, i32
  }
  func.func @transform_3(%arg0: i32) -> (i32, i32) {
    %c0_i32 = arith.constant 0 : i32
    %c0_i32_0 = arith.constant 0 : i32
    return %arg0, %c0_i32 : i32, i32
  }
}

</mosaic_0001>

<bundles_post_ra>
// kernel: single_step_loss.1
= control target key start
LH: loop header
LB: loop body
LE: loop exit
PB: predicated region body
PF: predicated region fallthrough
CT: control target
= control target key end

     0   :  { %vm57_vm0 = vcmask 64512   ;;  %s693_s0 = inlined_call_operand.vmem [shape: f32[8,512], index: 0, kind: input, shape index: {}]   ;;  %s694_s1 = inlined_call_operand.vmem [shape: f32[8,512], index: 1, kind: input, shape index: {}]   ;;  %s695_s2 = inlined_call_operand.vmem [shape: f32[144,32], index: 2, kind: input, shape index: {}]   ;;  %s696_s3 = inlined_call_operand.hbm [shape: f32[1,1], index: 3, kind: output, shape index: {}]  }
   0x1   :  { %v33_v0 = vld [vmem:[%s693_s0] sm:$0xff]  ;;  %v34_v1 = vld [vmem:[%s693_s0 + $0x8] sm:$0xff]  ;;  %v35_v2 = vld [vmem:[%s693_s0 + $0x10] sm:$0xff] }
   0x2   :  { %85 = vmatpush.msra.mxu0 %v33_v0  ;;  %114 = vmatpush.msra.mxu1 %v34_v1  ;;  %v36_v3 = vld [vmem:[%s693_s0 + $0x18] sm:$0xff]  ;;  %v15_v4 = vld [vmem:[%s695_s2] sm:$0xff]  ;;  %v25_v5 = vld [vmem:[%s695_s2 + $0x50] sm:$0xff] }
   0x3   :  { %143 = vmatpush.msra.mxu2 %v35_v2  ;;  %172 = vmatpush.msra.mxu3 %v36_v3  ;;  %v27_v6 = vld [vmem:[%s695_s2 + $0x60] sm:$0xff] }
   0x4   :  { %497 = vmatmul.msk.f32.vlgmr.msra.gmra.mxu0 %vm57_vm0, %v15_v4  ;;  %501 = vmatmul.msk.f32.vlgmr.msra.gmra.mxu1 %vm57_vm0, %v15_v4 }
   0x5   :  { %505 = vmatmul.msk.f32.vlgmr.msra.gmra.mxu2 %vm57_vm0, %v15_v4  ;;  %509 = vmatmul.msk.f32.vlgmr.msra.gmra.mxu3 %vm57_vm0, %v15_v4 }
   0x6   :  { %8 = vsyncpa [#allocation3], 0  ;;  %v554_v7 = vmov 0   ;;  %v16_v8 = vld [vmem:[%s695_s2 + $0x8] sm:$0xff]  ;;  %v26_v10 = vld [vmem:[%s695_s2 + $0x58] sm:$0xff]  ;;  %vm222_vm1 = vcmask 261120  }
   0x7   :  { %538 = vset.pattern.permute.xlu1 %v554_v7  ;;  %537 = vset.pattern.permute.xlu0 %v554_v7  ;;  %v24_v9 = vld [vmem:[%s695_s2 + $0x48] sm:$0xff]  ;;  %v17_v11 = vld [vmem:[%s695_s2 + $0x10] sm:$0xff]  ;;  %v18_v14 = vld [vmem:[%s695_s2 + $0x18] sm:$0xff]  ;;  %s487_s8 = sshll.u32 %s696_s3, 4  ;;  %s555_s11 = smov [#allocation2]   ;;  %s488_s8 = int_to_ptr.hbm [resolvable:$true] %s487_s8 }
   0x8   :  { %44 = vperm.xlu1 %538, %v25_v5   ;;  %54 = vperm.xlu0 %537, %v27_v6   ;;  %v29_v12 = vld [vmem:[%s695_s2 + $0x70] sm:$0xff]  ;;  %v28_v13 = vld [vmem:[%s695_s2 + $0x68] sm:$0xff]  ;;  %v19_v59 = vld [vmem:[%s695_s2 + $0x20] sm:$0xff] }
   0x9   :  { %539 = vset.pattern.permute.xlu2 %v554_v7  ;;  %v31_v0 = vld [vmem:[%s695_s2 + $0x80] sm:$0xff]  ;;  %v20_v5 = vld [vmem:[%s695_s2 + $0x28] sm:$0xff]  ;;  %v30_v6 = vld [vmem:[%s695_s2 + $0x78] sm:$0xff] }
   0xa   :  { %219 = vperm.xlu2 %539, %v31_v0   ;;  %v21_v7 = vld [vmem:[%s695_s2 + $0x30] sm:$0xff] }
   0xc   :  { %498 = vmatmul.msk.f32.gmra.mxu0 %vm57_vm0, %v16_v8  ;;  %502 = vmatmul.msk.f32.gmra.mxu1 %vm57_vm0, %v16_v8 }
   0xd   :  { %506 = vmatmul.msk.f32.gmra.mxu2 %vm57_vm0, %v16_v8  ;;  %510 = vmatmul.msk.f32.gmra.mxu3 %vm57_vm0, %v16_v8  ;;  %v32_v8 = vld [vmem:[%s695_s2 + $0x88] sm:$0xff] }
  0x10   :  { %39 = vperm.xlu1 %538, %v24_v9   ;;  %49 = vperm.xlu0 %537, %v26_v10   ;;  %v22_v9 = vld [vmem:[%s695_s2 + $0x38] sm:$0xff] }
  0x12   :  { %214 = vperm.xlu2 %539, %v30_v6  }
  0x14   :  { %499 = vmatmul.msk.f32.gmra.mxu0 %vm57_vm0, %v17_v11  ;;  %503 = vmatmul.msk.f32.gmra.mxu1 %vm57_vm0, %v17_v11 }
  0x15   :  { %507 = vmatmul.msk.f32.gmra.mxu2 %vm57_vm0, %v17_v11  ;;  %511 = vmatmul.msk.f32.gmra.mxu3 %vm57_vm0, %v17_v11 }
  0x18   :  { %209 = vperm.xlu0 %537, %v29_v12   ;;  %204 = vperm.xlu1 %538, %v28_v13  }
  0x1a   :  { %369 = vperm.xlu2 %539, %v32_v8  }
  0x1c   :  { %500 = vmatmul.msk.f32.gmra.mxu0 %vm57_vm0, %v18_v14  ;;  %504 = vmatmul.msk.f32.gmra.mxu1 %vm57_vm0, %v18_v14 }
  0x1d   :  { %508 = vmatmul.msk.f32.gmra.mxu2 %vm57_vm0, %v18_v14  ;;  %512 = vmatmul.msk.f32.gmra.mxu3 %vm57_vm0, %v18_v14 }
  0x64   :  { %v220_v14 = vpop.permute.xlu2 %219 }
  0x7a   :  { %v55_v21 = vpop.permute.xlu0 %54  ;;  %v45_v26 = vpop.permute.xlu1 %44 }
  0x81   :  { %v87_v15 = vpop.f32.mrf.mxu0  ;;  %v116_v16 = vpop.f32.mrf.mxu1 }
  0x82   :  { %v50_v27 = vpop.permute.xlu0 %49  ;;  %v40_v40 = vpop.permute.xlu1 %39 }
  0x83   :  { %v88_v43 = vadd.f32 %v87_v15, %v40_v40  ;;  %v117_v44 = vadd.f32 %v116_v16, %v40_v40 }
  0x85   :  { %v186_v53 = vmax.f32 %v88_v43, 0.0  ;;  %v187_v54 = vmax.f32 %v117_v44, 0.0  ;;  %v23_v44 = vld [vmem:[%s695_s2 + $0x40] sm:$0xff] }
  0x88   :  { %v145_v17 = vpop.f32.mrf.mxu2  ;;  %v174_v18 = vpop.f32.mrf.mxu3 }
  0x89   :  { %v90_v19 = vpop.f32.mrf.mxu0  ;;  %v119_v20 = vpop.f32.mrf.mxu1  ;;  %v146_v60 = vadd.f32 %v145_v17, %v40_v40  ;;  %v175_v61 = vadd.f32 %v174_v18, %v40_v40 }
  0x8a   :  { %v91_v36 = vadd.f32 %v90_v19, %v45_v26  ;;  %v120_v37 = vadd.f32 %v119_v20, %v45_v26 }
  0x8b   :  { %v188_v3 = vmax.f32 %v146_v60, 0.0  ;;  %v189_v4 = vmax.f32 %v175_v61, 0.0 }
  0x8c   :  { %v190_v45 = vmax.f32 %v91_v36, 0.0  ;;  %v191_v46 = vmax.f32 %v120_v37, 0.0 }
  0x90   :  { %v148_v22 = vpop.f32.mrf.mxu2  ;;  %v177_v23 = vpop.f32.mrf.mxu3 }
  0x91   :  { %v93_v24 = vpop.f32.mrf.mxu0  ;;  %v122_v25 = vpop.f32.mrf.mxu1  ;;  %v149_v55 = vadd.f32 %v148_v22, %v45_v26  ;;  %v178_v56 = vadd.f32 %v177_v23, %v45_v26 }
  0x92   :  { %v94_v32 = vadd.f32 %v93_v24, %v50_v27  ;;  %v123_v33 = vadd.f32 %v122_v25, %v50_v27  ;;  %v210_v26 = vpop.permute.xlu0 %209 }
  0x93   :  { %v192_v1 = vmax.f32 %v149_v55, 0.0  ;;  %v193_v2 = vmax.f32 %v178_v56, 0.0 }
  0x94   :  { %v194_v41 = vmax.f32 %v94_v32, 0.0  ;;  %v195_v42 = vmax.f32 %v123_v33, 0.0 }
  0x98   :  { %v151_v28 = vpop.f32.mrf.mxu2  ;;  %v180_v29 = vpop.f32.mrf.mxu3 }
  0x99   :  { %v96_v30 = vpop.f32.mrf.mxu0  ;;  %v125_v31 = vpop.f32.mrf.mxu1  ;;  %v152_v49 = vadd.f32 %v151_v28, %v50_v27  ;;  %v181_v50 = vadd.f32 %v180_v29, %v50_v27 }
  0x9a   :  { %v97_v34 = vadd.f32 %v96_v30, %v55_v21  ;;  %v126_v35 = vadd.f32 %v125_v31, %v55_v21  ;;  %v205_v31 = vpop.permute.xlu1 %204 }
  0x9b   :  { %v196_v62 = vmax.f32 %v152_v49, 0.0  ;;  %v197_v63 = vmax.f32 %v181_v50, 0.0 }
  0x9c   :  { %v198_v38 = vmax.f32 %v97_v34, 0.0  ;;  %v199_v39 = vmax.f32 %v126_v35, 0.0 }
  0x9e   :  { %247 = vmatpush.msrb.mxu0 %v198_v38  ;;  %276 = vmatpush.msrb.mxu1 %v199_v39 }
  0xa0   :  { %v154_v47 = vpop.f32.mrf.mxu2  ;;  %v183_v48 = vpop.f32.mrf.mxu3  ;;  %248 = vmatpush.msrb.mxu0 %v194_v41  ;;  %277 = vmatpush.msrb.mxu1 %v195_v42 }
  0xa1   :  { %v155_v51 = vadd.f32 %v154_v47, %v55_v21  ;;  %v184_v52 = vadd.f32 %v183_v48, %v55_v21  ;;  %v215_v21 = vpop.permute.xlu2 %214 }
  0xa2   :  { %249 = vmatpush.msrb.mxu0 %v190_v45  ;;  %278 = vmatpush.msrb.mxu1 %v191_v46 }
  0xa3   :  { %v200_v57 = vmax.f32 %v155_v51, 0.0  ;;  %v201_v58 = vmax.f32 %v184_v52, 0.0 }
  0xa4   :  { %250 = vmatpush.msrb.mxu0 %v186_v53  ;;  %279 = vmatpush.msrb.mxu1 %v187_v54 }
  0xa5   :  { %305 = vmatpush.msrb.mxu2 %v200_v57  ;;  %334 = vmatpush.msrb.mxu3 %v201_v58 }
  0xa6   :  { %513 = vmatmul.msk.f32.vlgmr.msrb.gmra.mxu0 %vm222_vm1, %v19_v59  ;;  %517 = vmatmul.msk.f32.vlgmr.msrb.gmra.mxu1 %vm222_vm1, %v19_v59 }
  0xa7   :  { %306 = vmatpush.msrb.mxu2 %v196_v62  ;;  %335 = vmatpush.msrb.mxu3 %v197_v63 }
  0xa9   :  { %307 = vmatpush.msrb.mxu2 %v192_v1  ;;  %336 = vmatpush.msrb.mxu3 %v193_v2  ;;  %v370_v1 = vpop.permute.xlu2 %369 }
  0xab   :  { %308 = vmatpush.msrb.mxu2 %v188_v3  ;;  %337 = vmatpush.msrb.mxu3 %v189_v4  ;;  %v455_v4 = vld [vmem:[%s694_s1] sm:$0xff] }
  0xac   :  { %521 = vmatmul.msk.f32.vlgmr.msrb.gmra.mxu2 %vm222_vm1, %v19_v59  ;;  %525 = vmatmul.msk.f32.vlgmr.msrb.gmra.mxu3 %vm222_vm1, %v19_v59 }
  0xae   :  { %514 = vmatmul.msk.f32.gmra.mxu0 %vm222_vm1, %v20_v5  ;;  %518 = vmatmul.msk.f32.gmra.mxu1 %vm222_vm1, %v20_v5 }
  0xb4   :  { %522 = vmatmul.msk.f32.gmra.mxu2 %vm222_vm1, %v20_v5  ;;  %526 = vmatmul.msk.f32.gmra.mxu3 %vm222_vm1, %v20_v5  ;;  %v456_v5 = vld [vmem:[%s694_s1 + $0x8] sm:$0xff] }
  0xb6   :  { %515 = vmatmul.msk.f32.gmra.mxu0 %vm222_vm1, %v21_v7  ;;  %519 = vmatmul.msk.f32.gmra.mxu1 %vm222_vm1, %v21_v7 }
  0xbc   :  { %523 = vmatmul.msk.f32.gmra.mxu2 %vm222_vm1, %v21_v7  ;;  %527 = vmatmul.msk.f32.gmra.mxu3 %vm222_vm1, %v21_v7 }
  0xbe   :  { %516 = vmatmul.msk.f32.gmra.mxu0 %vm222_vm1, %v22_v9  ;;  %520 = vmatmul.msk.f32.gmra.mxu1 %vm222_vm1, %v22_v9 }
  0xc4   :  { %524 = vmatmul.msk.f32.gmra.mxu2 %vm222_vm1, %v22_v9  ;;  %528 = vmatmul.msk.f32.gmra.mxu3 %vm222_vm1, %v22_v9  ;;  %v457_v9 = vld [vmem:[%s694_s1 + $0x10] sm:$0xff] }
 0x123   :  { %v252_v10 = vpop.f32.mrf.mxu0  ;;  %v281_v11 = vpop.f32.mrf.mxu1 }
 0x124   :  { %v253_v38 = vadd.f32 %v252_v10, %v205_v31  ;;  %v282_v39 = vadd.f32 %v281_v11, %v205_v31  ;;  %v458_v11 = vld [vmem:[%s694_s1 + $0x18] sm:$0xff] }
 0x126   :  { %v351_v42 = vmax.f32 %v253_v38, 0.0  ;;  %v352_v43 = vmax.f32 %v282_v39, 0.0 }
 0x12b   :  { %v255_v12 = vpop.f32.mrf.mxu0  ;;  %v284_v13 = vpop.f32.mrf.mxu1 }
 0x12c   :  { %v256_v29 = vadd.f32 %v255_v12, %v210_v26  ;;  %v285_v30 = vadd.f32 %v284_v13, %v210_v26 }
 0x12e   :  { %v355_v40 = vmax.f32 %v256_v29, 0.0  ;;  %v356_v41 = vmax.f32 %v285_v30, 0.0 }
 0x12f   :  { %v310_v15 = vpop.f32.mrf.mxu2  ;;  %v339_v16 = vpop.f32.mrf.mxu3 }
 0x130   :  { %v311_v55 = vadd.f32 %v310_v15, %v205_v31  ;;  %v340_v56 = vadd.f32 %v339_v16, %v205_v31 }
 0x132   :  { %v353_v61 = vmax.f32 %v311_v55, 0.0  ;;  %v354_v62 = vmax.f32 %v340_v56, 0.0 }
 0x133   :  { %v258_v17 = vpop.f32.mrf.mxu0  ;;  %v287_v18 = vpop.f32.mrf.mxu1 }
 0x134   :  { %v259_v22 = vadd.f32 %v258_v17, %v215_v21  ;;  %v288_v23 = vadd.f32 %v287_v18, %v215_v21 }
 0x136   :  { %v359_v34 = vmax.f32 %v259_v22, 0.0  ;;  %v360_v35 = vmax.f32 %v288_v23, 0.0 }
 0x137   :  { %v313_v19 = vpop.f32.mrf.mxu2  ;;  %v342_v20 = vpop.f32.mrf.mxu3 }
 0x138   :  { %v314_v51 = vadd.f32 %v313_v19, %v210_v26  ;;  %v343_v52 = vadd.f32 %v342_v20, %v210_v26 }
 0x13a   :  { %v357_v59 = vmax.f32 %v314_v51, 0.0  ;;  %v358_v60 = vmax.f32 %v343_v52, 0.0 }
 0x13b   :  { %v261_v24 = vpop.f32.mrf.mxu0  ;;  %v290_v25 = vpop.f32.mrf.mxu1 }
 0x13c   :  { %v262_v27 = vadd.f32 %v261_v24, %v220_v14  ;;  %v291_v28 = vadd.f32 %v290_v25, %v220_v14 }
 0x13e   :  { %v363_v32 = vmax.f32 %v262_v27, 0.0  ;;  %v364_v33 = vmax.f32 %v291_v28, 0.0 }
 0x13f   :  { %v316_v36 = vpop.f32.mrf.mxu2  ;;  %v345_v37 = vpop.f32.mrf.mxu3 }
 0x140   :  { %387 = vmatpush.msra.mxu0 %v363_v32  ;;  %407 = vmatpush.msra.mxu1 %v364_v33  ;;  %v317_v47 = vadd.f32 %v316_v36, %v215_v21  ;;  %v346_v48 = vadd.f32 %v345_v37, %v215_v21 }
 0x142   :  { %388 = vmatpush.msra.mxu0 %v359_v34  ;;  %408 = vmatpush.msra.mxu1 %v360_v35  ;;  %v361_v57 = vmax.f32 %v317_v47, 0.0  ;;  %v362_v58 = vmax.f32 %v346_v48, 0.0 }
 0x144   :  { %389 = vmatpush.msra.mxu0 %v355_v40  ;;  %409 = vmatpush.msra.mxu1 %v356_v41 }
 0x146   :  { %390 = vmatpush.msra.mxu0 %v351_v42  ;;  %410 = vmatpush.msra.mxu1 %v352_v43 }
 0x147   :  { %v319_v45 = vpop.f32.mrf.mxu2  ;;  %v348_v46 = vpop.f32.mrf.mxu3  ;;  %529 = vmatmul.msk.f32.vlgmr.msra.gmra.mxu0 %vm222_vm1, %v23_v44  ;;  %530 = vmatmul.msk.f32.vlgmr.msra.gmra.mxu1 %vm222_vm1, %v23_v44 }
 0x148   :  { %v320_v49 = vadd.f32 %v319_v45, %v220_v14  ;;  %v349_v50 = vadd.f32 %v348_v46, %v220_v14 }
 0x14a   :  { %v365_v53 = vmax.f32 %v320_v49, 0.0  ;;  %v366_v54 = vmax.f32 %v349_v50, 0.0 }
 0x14c   :  { %427 = vmatpush.msra.mxu2 %v365_v53  ;;  %447 = vmatpush.msra.mxu3 %v366_v54 }
 0x14e   :  { %428 = vmatpush.msra.mxu2 %v361_v57  ;;  %448 = vmatpush.msra.mxu3 %v362_v58 }
 0x150   :  { %429 = vmatpush.msra.mxu2 %v357_v59  ;;  %449 = vmatpush.msra.mxu3 %v358_v60 }
 0x152   :  { %430 = vmatpush.msra.mxu2 %v353_v61  ;;  %450 = vmatpush.msra.mxu3 %v354_v62 }
 0x153   :  { %531 = vmatmul.msk.f32.vlgmr.msra.gmra.mxu2 %vm222_vm1, %v23_v44  ;;  %532 = vmatmul.msk.f32.vlgmr.msra.gmra.mxu3 %vm222_vm1, %v23_v44 }
 0x1c4   :  { %v392_v63 = vpop.f32.mrf.mxu0  ;;  %v412_v0 = vpop.f32.mrf.mxu1 }
 0x1c5   :  { %v393_v2 = vadd.f32 %v392_v63, %v370_v1  ;;  %v413_v3 = vadd.f32 %v412_v0, %v370_v1 }
 0x1c7   :  { %v459_v6 = vsub.f32 %v393_v2, %v455_v4  ;;  %v460_v7 = vsub.f32 %v413_v3, %v456_v5 }
 0x1c9   :  { %v463_v12 = vmul.f32 %v459_v6, %v459_v6  ;;  %v464_v13 = vmul.f32 %v460_v7, %v460_v7 }
 0x1cb   :  { %v467_v18 = vadd.f32 %v464_v13, %v463_v12 }
 0x1d6   :  { %v432_v8 = vpop.f32.mrf.mxu2  ;;  %v452_v10 = vpop.f32.mrf.mxu3 }
 0x1d7   :  { %v433_v14 = vadd.f32 %v432_v8, %v370_v1  ;;  %v453_v15 = vadd.f32 %v452_v10, %v370_v1 }
 0x1d9   :  { %v461_v16 = vsub.f32 %v433_v14, %v457_v9  ;;  %v462_v17 = vsub.f32 %v453_v15, %v458_v11 }
 0x1db   :  { %v465_v19 = vmul.f32 %v461_v16, %v461_v16  ;;  %v466_v20 = vmul.f32 %v462_v17, %v462_v17 }
 0x1dd   :  { %v468_v21 = vadd.f32 %v467_v18, %v465_v19 }
 0x1df   :  { %v469_v22 = vadd.f32 %v468_v21, %v466_v20 }
 0x1e1   :  { %470 = vadd.xlane.f32.xlu0 %v469_v22 }
 0x254   :  { %v471_v23 = vpop.xlane.xlu0 %470 }
 0x255   :  { %v472_v24 = vrot.slane %v471_v23, 4 }
 0x257   :  { %v473_v25 = vadd.f32 %v472_v24, %v471_v23 }
 0x259   :  { %v474_v26 = vrot.slane %v473_v25, 2 }
 0x25b   :  { %v475_v27 = vadd.f32 %v474_v26, %v473_v25 }
 0x25d   :  { %v476_v28 = vrot.slane %v475_v27, 1 }
 0x25f   :  { %v477_v29 = vadd.f32 %v476_v28, %v475_v27 }
 0x261   :  { %533 = vpush %v477_v29 }
 0x292   :  { %s534_s9 = spop %533 }
 0x293   :  { %s479_s10 = smul.f32 0.00048828125, %s534_s9 }
 0x295   :  { %481 = sst [smem:[#allocation2]] %s479_s10 }
 0x296   :  { %490 = dma.smem_to_hbm %s555_s11, 16, %s488_s8, [#allocation3]  }
 0x297   :  { %552 = dma.done.wait [#allocation3], 16  }
 0x298   :  { %553 = vsyncadd [#allocation3], 4294967280 }
 0x299   :  { %495 = sfence }
 0x29a   :  { %496 = vsyncpa [#allocation3], 1 }

</bundles_post_ra>
